<compile_context>
chip_gen: v7x
topology: tpu7x:2x2x1
jax: 0.10.0
libtpu: 0.0.40
codegen_flags: <defaults>
</compile_context>

<pallas_src>
import functools

import jax
import jax.numpy as jnp
from jax import lax
from jax.experimental import pallas as pl
from jax.experimental.pallas import tpu as pltpu

_COLS = 512                              # lane axis: multiple of 128 -> unmasked vector loads
_DEFAULT_BLOCK_BYTES = 4 * 1024 * 1024   # ~4 MiB per input per pipeline buffer


def _hinge_kernel(pos_ref, neg_ref, out_ref, *, n, block_rows):
    """One (block_rows, _COLS) tile -> raw partial hinge sum in out_ref[0, 0] (SMEM)."""
    i = pl.program_id(0)

    pos = pos_ref[...].astype(jnp.float32)
    neg = neg_ref[...].astype(jnp.float32)
    # Hinge: max(0, 1 - (pos - neg)). Pure VPU work + XLU reduces; no MXU.
    loss = jnp.maximum(1.0 - (pos - neg), 0.0)

    block_elems = block_rows * _COLS          # static Python int
    # int32 math is fine for n < 2**31 elements.
    is_full = (i + 1) * block_elems <= n

    @pl.when(is_full)
    def _():
        # Fast path: block fully in-bounds, no masking needed.
        out_ref[0, 0] = jnp.sum(jnp.sum(loss, axis=1))

    @pl.when(jnp.logical_not(is_full))
    def _():
        # Ragged tail (at most one block): mask elements whose global flat
        # index >= n (covers both the padded lane-row and any rows past the
        # array edge whose VMEM contents are undefined).
        row_ids = lax.broadcasted_iota(jnp.int32, loss.shape, 0)
        col_ids = lax.broadcasted_iota(jnp.int32, loss.shape, 1)
        flat = (i * block_rows + row_ids) * _COLS + col_ids
        masked = jnp.where(flat < n, loss, 0.0)
        out_ref[0, 0] = jnp.sum(jnp.sum(masked, axis=1))


def hinge_loss(positive_score: jax.Array, negative_score: jax.Array,
               *, block_bytes: int = _DEFAULT_BLOCK_BYTES) -> jax.Array:
    """Hinge loss: mean(clamp(1 - (pos - neg), min=0)). Returns an f32 scalar."""
    if positive_score.shape != negative_score.shape:
        raise ValueError(
            f"Shape mismatch: {positive_score.shape}, {negative_score.shape}"
        )

    n = positive_score.size
    if n == 0:
        # torch: clamp(empty).mean() -> NaN
        return jnp.float32(float("nan"))

    pos_flat = positive_score.reshape(-1)
    neg_flat = negative_score.reshape(-1)

    rows = -(-n // _COLS)
    padded_total = rows * _COLS
    if padded_total != n:
        # At most one 512-wide lane-row of zeros per input. Pad values are
        # irrelevant (masked in-kernel); zeros are the cheapest constant.
        pos_flat = jnp.pad(pos_flat, (0, padded_total - n))
        neg_flat = jnp.pad(neg_flat, (0, padded_total - n))
    # Contiguous row-major reshape: free / layout-preserving, no HBM copy.
    pos2d = pos_flat.reshape(rows, _COLS)
    neg2d = neg_flat.reshape(rows, _COLS)

    itemsize = jnp.dtype(positive_score.dtype).itemsize
    # ~block_bytes per input per buffer; keep the row dim a multiple of 8
    # (sublanes) unless the whole array fits in one block (full-extent rule).
    target_rows = max(8, (block_bytes // (_COLS * itemsize)) // 8 * 8)
    block_rows = rows if rows <= target_rows else target_rows
    num_blocks = -(-rows // block_rows)

    block_bytes_actual = block_rows * _COLS * itemsize
    # 2 inputs x 2 pipeline buffers + slack for internal scratch / SMEM output.
    vmem_limit = 4 * block_bytes_actual + (4 << 20)

    kernel = functools.partial(_hinge_kernel, n=n, block_rows=block_rows)

    partials = pl.pallas_call(
        kernel,
        out_shape=jax.ShapeDtypeStruct((num_blocks, 1), jnp.float32),
        grid=(num_blocks,),
        in_specs=[
            pl.BlockSpec((block_rows, _COLS), lambda i: (i, 0)),
            pl.BlockSpec((block_rows, _COLS), lambda i: (i, 0)),
        ],
        # Per-block scalar partial sums live in SMEM; each grid step owns its
        # own (1,1) block, so the grid axis is safely "parallel" (megacore).
        out_specs=pl.BlockSpec((1, 1), lambda i: (i, 0),
                               memory_space=pltpu.MemorySpace.SMEM),
        compiler_params=pltpu.CompilerParams(
            dimension_semantics=("parallel",),
            vmem_limit_bytes=int(vmem_limit),
        ),
        cost_estimate=pl.CostEstimate(
            flops=3 * padded_total,
            transcendentals=0,
            bytes_accessed=2 * padded_total * itemsize + num_blocks * 4,
        ),
    )(pos2d, neg2d)

    # Tiny finalize in plain JAX: sum per-block partials, divide by the true N.
    return jnp.sum(partials) / jnp.float32(n)


# TODO(synk): backward pass (torch.autograd) is not implemented; forward only.


if __name__ == "__main__":
    key = jax.random.PRNGKey(0)
    k1, k2, k3, k4, k5, k6 = jax.random.split(key, 6)

    # Small shape consistent with the module's forward (1-D score vectors).
    N = 8
    positive_score = jax.random.normal(k1, (N,), dtype=jnp.float32)
    negative_score = jax.random.normal(k2, (N,), dtype=jnp.float32)

    loss = hinge_loss(positive_score, negative_score)
    jax.block_until_ready(loss)
    ref = jnp.mean(jnp.maximum(1.0 - (positive_score - negative_score), 0.0))
    assert jnp.allclose(loss, ref, atol=1e-6, rtol=1e-6), (loss, ref)

    # Exercise grid > 1, a ragged last block and a ragged last lane-row with
    # bf16 inputs; a tiny block_bytes keeps this test small (block_rows = 8).
    N2 = 20 * _COLS + 37
    p2 = jax.random.normal(k3, (N2,), dtype=jnp.bfloat16)
    n2 = jax.random.normal(k4, (N2,), dtype=jnp.bfloat16)
    loss2 = hinge_loss(p2, n2, block_bytes=8 * _COLS * 2)
    jax.block_until_ready(loss2)
    ref2 = jnp.mean(
        jnp.maximum(1.0 - (p2.astype(jnp.float32) - n2.astype(jnp.float32)), 0.0)
    )
    assert jnp.allclose(loss2, ref2, atol=1e-4, rtol=1e-4), (loss2, ref2)

    # N % 512 == 0: zero-copy reshape path (no padding at all), single block.
    N3 = 4 * _COLS
    p3 = jax.random.normal(k5, (N3,), dtype=jnp.float32)
    n3 = jax.random.normal(k6, (N3,), dtype=jnp.float32)
    loss3 = hinge_loss(p3, n3)
    jax.block_until_ready(loss3)
    ref3 = jnp.mean(jnp.maximum(1.0 - (p3 - n3), 0.0))
    assert jnp.allclose(loss3, ref3, atol=1e-6, rtol=1e-6), (loss3, ref3)

    print("KERNEL_OK")
</pallas_src>

<mosaic_0001>
module attributes {stable_mosaic.version = 11 : i64} {
  func.func @_hinge_kernel(%arg0: i32, %arg1: memref<1x512xf32, #tpu.memory_space<vmem>>, %arg2: memref<1x512xf32, #tpu.memory_space<vmem>>, %arg3: memref<1x1xf32, #tpu.memory_space<smem>>) attributes {dimension_semantics = [#tpu.dimension_semantics<parallel>], iteration_bounds = array<i64: 1>, scalar_prefetch = 0 : i64, scratch_operands = 0 : i64, tpu.core_type = #tpu.core_type<tc>, window_params = [{transform_indices = @transform_0, window_bounds = array<i64: 1, 512>}, {transform_indices = @transform_1, window_bounds = array<i64: 1, 512>}, {transform_indices = @transform_2, window_bounds = array<i64: 1, 1>}]} {
    %c0 = arith.constant 0 : index
    %c0_0 = arith.constant 0 : index
    %0 = vector.load %arg1[%c0, %c0_0] : memref<1x512xf32, #tpu.memory_space<vmem>>, vector<1x512xf32>
    %c0_1 = arith.constant 0 : index
    %c0_2 = arith.constant 0 : index
    %1 = vector.load %arg2[%c0_1, %c0_2] : memref<1x512xf32, #tpu.memory_space<vmem>>, vector<1x512xf32>
    %2 = arith.subf %0, %1 : vector<1x512xf32>
    %cst = arith.constant 1.000000e+00 : f32
    %3 = vector.broadcast %cst : f32 to vector<1x512xf32>
    %4 = arith.subf %3, %2 : vector<1x512xf32>
    %cst_3 = arith.constant 0.000000e+00 : f32
    %5 = vector.broadcast %cst_3 : f32 to vector<1x512xf32>
    %6 = arith.maximumf %4, %5 : vector<1x512xf32>
    %c1_i32 = arith.constant 1 : i32
    %7 = arith.addi %arg0, %c1_i32 : i32
    %c512_i32 = arith.constant 512 : i32
    %8 = arith.muli %7, %c512_i32 : i32
    %c8_i32 = arith.constant 8 : i32
    %9 = arith.cmpi sle, %8, %c8_i32 : i32
    %10 = arith.extui %9 : i1 to i32
    %c0_i32 = arith.constant 0 : i32
    %11 = arith.cmpi ne, %10, %c0_i32 : i32
    scf.if %11 {
      %cst_5 = arith.constant dense<0.000000e+00> : vector<1xf32>
      %15 = vector.multi_reduction <add>, %6, %cst_5 [1] : vector<1x512xf32> to vector<1xf32>
      %16 = vector.shape_cast %15 : vector<1xf32> to vector<1x1xf32>
      %cst_6 = arith.constant dense<0.000000e+00> : vector<1xf32>
      %17 = vector.multi_reduction <add>, %16, %cst_6 [1] : vector<1x1xf32> to vector<1xf32>
      %18 = vector.shape_cast %17 : vector<1xf32> to vector<1x1xf32>
      %19 = vector.extract %18[0, 0] : f32 from vector<1x1xf32>
      %c0_7 = arith.constant 0 : index
      %c0_8 = arith.constant 0 : index
      %20 = memref.load %arg3[%c0_7, %c0_8] : memref<1x1xf32, #tpu.memory_space<smem>>
      memref.store %19, %arg3[%c0_7, %c0_8] : memref<1x1xf32, #tpu.memory_space<smem>>
    } else {
    }
    %true = arith.constant true
    %12 = arith.xori %9, %true : i1
    %13 = arith.extui %12 : i1 to i32
    %c0_i32_4 = arith.constant 0 : i32
    %14 = arith.cmpi ne, %13, %c0_i32_4 : i32
    scf.if %14 {
      %15 = tpu.iota {dimensions = array<i32: 0>} : vector<1x512xi32>
      %16 = tpu.iota {dimensions = array<i32: 1>} : vector<1x512xi32>
      %c1_i32_5 = arith.constant 1 : i32
      %17 = arith.muli %arg0, %c1_i32_5 : i32
      %18 = vector.broadcast %17 : i32 to vector<1x512xi32>
      %19 = arith.addi %18, %15 : vector<1x512xi32>
      %c512_i32_6 = arith.constant 512 : i32
      %20 = vector.broadcast %c512_i32_6 : i32 to vector<1x512xi32>
      %21 = arith.muli %19, %20 : vector<1x512xi32>
      %22 = arith.addi %21, %16 : vector<1x512xi32>
      %c8_i32_7 = arith.constant 8 : i32
      %23 = vector.broadcast %c8_i32_7 : i32 to vector<1x512xi32>
      %24 = arith.cmpi slt, %22, %23 : vector<1x512xi32>
      %cst_8 = arith.constant 0.000000e+00 : f32
      %25 = vector.broadcast %cst_8 : f32 to vector<1x512xf32>
      %26 = arith.select %24, %6, %25 : vector<1x512xi1>, vector<1x512xf32>
      %cst_9 = arith.constant dense<0.000000e+00> : vector<1xf32>
      %27 = vector.multi_reduction <add>, %26, %cst_9 [1] : vector<1x512xf32> to vector<1xf32>
      %28 = vector.shape_cast %27 : vector<1xf32> to vector<1x1xf32>
      %cst_10 = arith.constant dense<0.000000e+00> : vector<1xf32>
      %29 = vector.multi_reduction <add>, %28, %cst_10 [1] : vector<1x1xf32> to vector<1xf32>
      %30 = vector.shape_cast %29 : vector<1xf32> to vector<1x1xf32>
      %31 = vector.extract %30[0, 0] : f32 from vector<1x1xf32>
      %c0_11 = arith.constant 0 : index
      %c0_12 = arith.constant 0 : index
      %32 = memref.load %arg3[%c0_11, %c0_12] : memref<1x1xf32, #tpu.memory_space<smem>>
      memref.store %31, %arg3[%c0_11, %c0_12] : memref<1x1xf32, #tpu.memory_space<smem>>
    } else {
    }
    return
  }
  func.func @transform_0(%arg0: i32) -> (i32, i32) {
    %c0_i32 = arith.constant 0 : i32
    %c0_i32_0 = arith.constant 0 : i32
    return %arg0, %c0_i32 : i32, i32
  }
  func.func @transform_1(%arg0: i32) -> (i32, i32) {
    %c0_i32 = arith.constant 0 : i32
    %c0_i32_0 = arith.constant 0 : i32
    return %arg0, %c0_i32 : i32, i32
  }
  func.func @transform_2(%arg0: i32) -> (i32, i32) {
    %c0_i32 = arith.constant 0 : i32
    %c0_i32_0 = arith.constant 0 : i32
    return %arg0, %c0_i32 : i32, i32
  }
}

</mosaic_0001>

<bundles_post_ra>
// kernel: tpu_custom_call.1
= control target key start
LH: loop header
LB: loop body
LE: loop exit
PB: predicated region body
PF: predicated region fallthrough
CT: control target
= control target key end

     0   :  { %7 = vsyncpa [#allocation3], 0  ;;  %s281_s0 = inlined_call_operand.hbm [shape: f32[1,512], index: 0, kind: input, shape index: {}]   ;;  %s282_s1 = inlined_call_operand.hbm [shape: f32[1,512], index: 1, kind: input, shape index: {}]   ;;  %s283_s2 = inlined_call_operand.hbm [shape: f32[1,1], index: 2, kind: output, shape index: {}]  }
   0x1   :  { %8 = vsyncpa [#allocation6], 0 }
   0x2   :  { %9 = vsyncpa [#allocation4], 0  ;;  %s223_s9 = smov [#allocation2]   ;;  %s224_s11 = smov [#allocation5]  }
   0x3   :  { %s16_s10 = sshll.u32 %s223_s9, 4  ;;  %s26_s12 = sshll.u32 %s224_s11, 4  ;;  %s17_s10 = int_to_ptr.vmem [resolvable:$true] %s16_s10  ;;  %s27_s12 = int_to_ptr.vmem [resolvable:$true] %s26_s12 }
   0x4   :  { %s163_s15 = scalar_lea.hbm %s281_s0, 64 }
   0x5   :  { %p164_p0 = scmp.ne.s32.totalorder %s281_s0, %s163_s15  ;;  %p167_p1 = scmp.lt.u32.totalorder %s163_s15, %s281_s0 }
   0x7   :  { %p169_p2 = pnand %p167_p1, %p164_p0 }
   0x9   :  { %172 = shalt.err (!%p169_p2)
}
   0xa   :  { %s173_s20 = scalar_lea.vmem %s17_s10, 64  ;;  %p178_p4 = scmp.lt.s32.totalorder %s17_s10, %s17_s10 }
   0xb   :  { %p174_p3 = scmp.ne.s32.totalorder %s17_s10, %s173_s20  ;;  %p179_p5 = scmp.lt.s32.totalorder %s173_s20, %s173_s20 }
   0xd   :  { %p180_p6 = por %p179_p5, %p178_p4 }
   0xf   :  { %p181_p7 = pnand %p180_p6, %p174_p3 }
  0x11   :  { %184 = shalt.err (!%p181_p7)
}
  0x12   :  { %19 = dma.hbm_to_vmem [thread:$0]  %s281_s0, 64, %s17_s10, [#allocation3]  }
  0x13   :  { %s185_s25 = scalar_lea.hbm %s282_s1, 64 }
  0x14   :  { %p186_p8 = scmp.ne.s32.totalorder %s282_s1, %s185_s25  ;;  %p189_p9 = scmp.lt.u32.totalorder %s185_s25, %s282_s1 }
  0x16   :  { %p191_p10 = pnand %p189_p9, %p186_p8 }
  0x18   :  { %194 = shalt.err (!%p191_p10)
}
  0x19   :  { %s195_s30 = scalar_lea.vmem %s27_s12, 64  ;;  %p200_p12 = scmp.lt.s32.totalorder %s27_s12, %s27_s12 }
  0x1a   :  { %p196_p11 = scmp.ne.s32.totalorder %s27_s12, %s195_s30  ;;  %p201_p13 = scmp.lt.s32.totalorder %s195_s30, %s195_s30 }
  0x1c   :  { %p202_p0 = por %p201_p13, %p200_p12 }
  0x1e   :  { %p203_p1 = pnand %p202_p0, %p196_p11 }
  0x20   :  { %206 = shalt.err (!%p203_p1)
}
  0x21   :  { %29 = dma.hbm_to_vmem [thread:$0]  %s282_s1, 64, %s27_s12, [#allocation6]  }
  0x22   :  { %217 = dma.done.wait [#allocation3], 64  }
  0x23   :  { %218 = vsyncadd [#allocation3], 4294967232 }
  0x24   :  { %219 = dma.done.wait [#allocation6], 64  }
  0x25   :  { %220 = vsyncadd [#allocation6], 4294967232  ;;  %v86_v0 = vlaneseq  ;;  %v36_v7 = vld [vmem:[#allocation2] sm:$0xf]  ;;  %v37_v8 = vld [vmem:[#allocation5] sm:$0xf] }
  0x26   :  { %v38_v9 = vsub.f32 %v36_v7, %v37_v8  ;;  %vm129_vm0 = vcmask 1040384   ;;  %s207_s6 = scalar_lea.hbm %s283_s2, 16 }
  0x27   :  { %v87_v1 = vshrl.u32 %v86_v0, 7  ;;  %v89_v2 = vand.u32 127, %v86_v0  ;;  %p208_p2 = scmp.ne.s32.totalorder %s283_s2, %s207_s6  ;;  %p211_p3 = scmp.lt.u32.totalorder %s207_s6, %s283_s2 }
  0x28   :  { %v39_v15 = vsub.f32 1.0, %v38_v9 }
  0x29   :  { %v90_v3 = vadd.s32 128, %v89_v2  ;;  %v91_v4 = vadd.s32 256, %v89_v2  ;;  %v92_v5 = vadd.s32 384, %v89_v2  ;;  %v95_v6 = vmul.u32 512, %v87_v1  ;;  %p213_p4 = pnand %p211_p3, %p208_p2 }
  0x2a   :  { %v107_v10 = vsub.s32 0, %v87_v1  ;;  %v111_v16 = vsub.s32 1, %v87_v1  ;;  %v115_v17 = vsub.s32 2, %v87_v1  ;;  %v119_v18 = vsub.s32 3, %v87_v1 }
  0x2b   :  { %v96_v11 = vadd.s32 %v95_v6, %v89_v2  ;;  %v97_v12 = vadd.s32 %v95_v6, %v90_v3  ;;  %v98_v13 = vadd.s32 %v95_v6, %v91_v4  ;;  %v99_v14 = vadd.s32 %v95_v6, %v92_v5 }
  0x2c   :  { %v40_v19 = vmax.f32 %v39_v15, 0.0 }
  0x2d   :  { %vm100_vm1 = vcmp.lt.s32.totalorder %v96_v11, 8  ;;  %vm101_vm2 = vcmp.lt.s32.totalorder %v97_v12, 8  ;;  %vm102_vm3 = vcmp.lt.s32.totalorder %v98_v13, 8  ;;  %vm103_vm4 = vcmp.lt.s32.totalorder %v99_v14, 8 }
  0x2e   :  { %v108_v20 = vrot.slane %v40_v19, %v107_v10  ;;  %v112_v21 = vrot.slane %v40_v19, %v111_v16  ;;  %v116_v22 = vrot.slane %v40_v19, %v115_v17  ;;  %v120_v23 = vrot.slane %v40_v19, %v119_v18 }
  0x30   :  { %v125_v24 = vsel %vm100_vm1, %v108_v20, 0.0  ;;  %v126_v25 = vsel %vm101_vm2, %v112_v21, 0.0  ;;  %v127_v26 = vsel %vm102_vm3, %v116_v22, 0.0  ;;  %v128_v27 = vsel %vm103_vm4, %v120_v23, 0.0 }
  0x31   :  { %v130_v28 = vsel %vm129_vm0, %v125_v24, 0.0  ;;  %v131_v29 = vsel %vm129_vm0, %v126_v25, 0.0  ;;  %v133_v30 = vsel %vm129_vm0, %v127_v26, 0.0  ;;  %v135_v32 = vsel %vm129_vm0, %v128_v27, 0.0 }
  0x32   :  { %v132_v31 = vadd.f32 %v131_v29, %v130_v28 }
  0x34   :  { %v134_v33 = vadd.f32 %v133_v30, %v132_v31 }
  0x36   :  { %v136_v34 = vadd.f32 %v135_v32, %v134_v33 }
  0x38   :  { %137 = vadd.xlane.f32.xlu0 %v136_v34 }
  0xc5   :  { %v138_v35 = vpop.xlane.xlu0 %137 }
  0xc6   :  { %158 = vpush %v138_v35 }
  0xf7   :  { %s159_s1 = spop %158 }
  0xf8   :  { %142 = sst [smem:[#allocation7]] %s159_s1 }
  0xf9   :  { %216 = shalt.err (!%p213_p4)
}
  0xfa   :  { %s225_s11 = smov [#allocation7]  }
  0xfb   :  { %150 = dma.smem_to_hbm %s225_s11, 16, %s283_s2, [#allocation4]  }
  0xfc   :  { %221 = dma.done.wait [#allocation4], 16  }
  0xfd   :  { %222 = vsyncadd [#allocation4], 4294967280 }
  0xfe   :  { %154 = sfence }
  0xff   :  { %155 = vsyncpa [#allocation3], 1 }
 0x100   :  { %156 = vsyncpa [#allocation6], 1 }
 0x101   :  { %157 = vsyncpa [#allocation4], 1 }

</bundles_post_ra>
